<compile_context>
chip_gen: v7x
topology: tpu7x:2x2x1
jax: 0.10.0
libtpu: 0.0.40
codegen_flags: <defaults>
</compile_context>

<pallas_src>
import jax
import jax.numpy as jnp
from jax.experimental import pallas as pl
from jax.experimental.pallas import tpu as pltpu

PACK_WIDTH = 128  # lane-dense width of the fused second-layer matmul


def _round_up(x, m):
    return ((x + m - 1) // m) * m


def _pick_tile(batch, block_b):
    """Batch tile: multiple of 8 sublanes, as large as possible (amortize the
    ~0.35us/step overhead) but split so the grid has >=2 steps when the batch
    allows it (v7x dual-TensorCore sharding via dimension_semantics)."""
    b8 = _round_up(max(batch, 1), 8)
    if b8 <= 8:
        return 8
    half = _round_up(pl.cdiv(b8, 2), 8)
    return max(8, min(block_b, half))


def actor_critic_kernel(x_ref, w1_ref, b1_ref, w2_ref, b2_ref, smax_bias_ref,
                        value_ref, policy_ref):
    num_actions = policy_ref.shape[-1]

    # ---- fused first layer (actor || critic): h = relu(x @ [Wa1|Wc1] + [ba1|bc1])
    x = x_ref[...].astype(w1_ref.dtype)                       # bf16 MXU operands
    h = jnp.dot(x, w1_ref[...], preferred_element_type=jnp.float32) + b1_ref[...]
    h = jnp.maximum(h, 0.0)                                   # (TB, 2H) f32

    # ---- fused, lane-dense second layer: block-diagonal w2 (2H, 128) ----
    # lanes 0..A-1 -> actor logits, lane A -> critic value, rest -> zero padding
    packed = jnp.dot(h.astype(w2_ref.dtype), w2_ref[...],
                     preferred_element_type=jnp.float32) + b2_ref[...]

    value_ref[...] = packed[:, num_actions:num_actions + 1].astype(value_ref.dtype)

    # softmax restricted to the policy lanes.  smax_bias is 0 on policy lanes
    # and -1e30 elsewhere, so exp underflows to exactly 0 outside them
    # (no extra where needed).  Epilogue kept in f32 (v5e has no bf16 VPU/EUP).
    logits = packed + smax_bias_ref[...]
    m = jnp.max(logits, axis=-1, keepdims=True)
    e = jnp.exp(logits - m)
    denom = jnp.sum(e, axis=-1, keepdims=True)
    r = pl.reciprocal(denom, approx=True)                     # EUP vrcp (free slot)
    r = r * (2.0 - denom * r)                                 # one Newton step (~1e-7 rel err)
    policy_ref[...] = (e[:, :num_actions] * r).astype(policy_ref.dtype)


def fuse_params(params, num_actions, *, use_bf16=True):
    """Host-side parameter fusion / lane packing (done once, outside the kernel)."""
    A = num_actions
    assert A + 1 <= PACK_WIDTH, "num_actions + 1 must fit in the 128 packed lanes"
    H = params["wa1"].shape[1]
    w_dtype = jnp.bfloat16 if use_bf16 else jnp.float32

    # layer 1: [actor | critic] along the output axis
    w1 = jnp.concatenate([params["wa1"], params["wc1"]], axis=1).astype(w_dtype)  # (in, 2H)
    b1 = jnp.concatenate([params["ba1"], params["bc1"]], axis=1)                  # (1, 2H) f32

    # layer 2: block-diagonal, lane-dense.  lanes 0..A-1 actor, lane A critic.
    w2 = jnp.zeros((2 * H, PACK_WIDTH), jnp.float32)
    w2 = w2.at[:H, 0:A].set(params["wa2"])
    w2 = w2.at[H:, A:A + 1].set(params["wc2"])
    w2 = w2.astype(w_dtype)
    b2 = jnp.zeros((1, PACK_WIDTH), jnp.float32)
    b2 = b2.at[:, 0:A].set(params["ba2"])
    b2 = b2.at[:, A:A + 1].set(params["bc2"])

    # additive softmax mask: 0 on policy lanes, -1e30 elsewhere (finite sentinel
    # so exp underflows to 0 -- keep this invariant if ever changed).
    lane = jnp.arange(PACK_WIDTH)
    smax_bias = jnp.where(lane < A, 0.0, -1e30).astype(jnp.float32)[None, :]      # (1, 128)

    return dict(w1=w1, b1=b1, w2=w2, b2=b2, smax_bias=smax_bias, num_actions=A)


def actor_critic_forward(x, fused, *, block_b=1024):
    """x: (B, num_inputs) f32. fused: output of fuse_params. Returns (value, policy)."""
    B, num_inputs = x.shape
    A = fused["num_actions"]
    two_h = fused["w1"].shape[1]

    TB = _pick_tile(B, block_b)
    grid = (pl.cdiv(B, TB),)          # no host-side pad; Pallas masks the partial last block

    w_bytes = fused["w1"].dtype.itemsize
    flops = 2 * B * num_inputs * two_h + 2 * B * two_h * PACK_WIDTH
    bytes_accessed = (
        4 * B * num_inputs                                    # x (f32 read)
        + w_bytes * (num_inputs * two_h + two_h * PACK_WIDTH)  # fused weights
        + 4 * (two_h + 2 * PACK_WIDTH)                         # biases + softmax mask
        + 4 * B * (1 + A)                                      # value + policy writeback
    )

    value, policy = pl.pallas_call(
        actor_critic_kernel,
        out_shape=(jax.ShapeDtypeStruct((B, 1), jnp.float32),
                   jax.ShapeDtypeStruct((B, A), jnp.float32)),
        grid=grid,
        in_specs=[
            pl.BlockSpec((TB, num_inputs), lambda i: (i, 0)),       # x: tiled over batch
            pl.BlockSpec((num_inputs, two_h), lambda i: (0, 0)),    # w1: VMEM-resident
            pl.BlockSpec((1, two_h), lambda i: (0, 0)),             # b1: resident
            pl.BlockSpec((two_h, PACK_WIDTH), lambda i: (0, 0)),    # w2: resident
            pl.BlockSpec((1, PACK_WIDTH), lambda i: (0, 0)),        # b2: resident
            pl.BlockSpec((1, PACK_WIDTH), lambda i: (0, 0)),        # softmax lane bias: resident
        ],
        out_specs=(pl.BlockSpec((TB, 1), lambda i: (i, 0)),
                   pl.BlockSpec((TB, A), lambda i: (i, 0))),
        compiler_params=pltpu.CompilerParams(
            dimension_semantics=("parallel",)),
        cost_estimate=pl.CostEstimate(
            flops=flops,
            transcendentals=B * PACK_WIDTH,
            bytes_accessed=bytes_accessed),
    )(x, fused["w1"], fused["b1"], fused["w2"], fused["b2"], fused["smax_bias"])
    return value, policy


def init_params(key, num_inputs, num_actions, hidden_size):
    """torch.nn.Linear-style init: U[-1/sqrt(fan_in), 1/sqrt(fan_in)].
    Weights stored (in_features, out_features); biases (1, out_features)."""
    def linear(key, fan_in, fan_out):
        kw, kb = jax.random.split(key)
        bound = 1.0 / jnp.sqrt(fan_in)
        w = jax.random.uniform(kw, (fan_in, fan_out), jnp.float32, -bound, bound)
        b = jax.random.uniform(kb, (1, fan_out), jnp.float32, -bound, bound)
        return w, b

    k1, k2, k3, k4 = jax.random.split(key, 4)
    wc1, bc1 = linear(k1, num_inputs, hidden_size)
    wc2, bc2 = linear(k2, hidden_size, 1)
    wa1, ba1 = linear(k3, num_inputs, hidden_size)
    wa2, ba2 = linear(k4, hidden_size, num_actions)
    return dict(wc1=wc1, bc1=bc1, wc2=wc2, bc2=bc2,
                wa1=wa1, ba1=ba1, wa2=wa2, ba2=ba2)


def reference_forward(x, p):
    """Plain-JAX reference reproducing the PyTorch forward (f32)."""
    h_c = jnp.maximum(x @ p["wc1"] + p["bc1"], 0.0)
    value = h_c @ p["wc2"] + p["bc2"]
    h_a = jnp.maximum(x @ p["wa1"] + p["ba1"], 0.0)
    logits = h_a @ p["wa2"] + p["ba2"]
    policy = jax.nn.softmax(logits, axis=1)
    return value, policy


if __name__ == "__main__":
    num_inputs, num_actions, hidden_size = 4, 6, 32

    key = jax.random.PRNGKey(0)
    k_params, k_x1, k_x2 = jax.random.split(key, 3)
    params = init_params(k_params, num_inputs, num_actions, hidden_size)
    fused = fuse_params(params, num_actions)        # bf16 MXU operands (default)

    # Tolerance is 3e-2 because the MXU operands are bf16 (set use_bf16=False in
    # fuse_params for an f32 path that meets ~1e-5).

    # small batch: single grid step with a partial block
    x_small = jax.random.normal(k_x1, (2, num_inputs), jnp.float32)
    value, policy = jax.block_until_ready(actor_critic_forward(x_small, fused))
    v_ref, p_ref = reference_forward(x_small, params)
    assert value.shape == (2, 1) and policy.shape == (2, num_actions)
    assert jnp.allclose(value, v_ref, atol=3e-2, rtol=3e-2)
    assert jnp.allclose(policy, p_ref, atol=3e-2, rtol=3e-2)
    assert jnp.allclose(jnp.sum(policy, axis=1), 1.0, atol=1e-5)   # f32 softmax normalization

    # larger batch: 2 grid steps (exercises v7x dual-TC sharding) + partial last block
    x_big = jax.random.normal(k_x2, (200, num_inputs), jnp.float32)
    value, policy = jax.block_until_ready(actor_critic_forward(x_big, fused))
    v_ref, p_ref = reference_forward(x_big, params)
    assert value.shape == (200, 1) and policy.shape == (200, num_actions)
    assert jnp.allclose(value, v_ref, atol=3e-2, rtol=3e-2)
    assert jnp.allclose(policy, p_ref, atol=3e-2, rtol=3e-2)
    assert jnp.allclose(jnp.sum(policy, axis=1), 1.0, atol=1e-5)

    print("KERNEL_OK")
</pallas_src>

<mosaic_0001>
module attributes {stable_mosaic.version = 11 : i64} {
  func.func @actor_critic_kernel(%arg0: i32, %arg1: memref<8x4xf32, #tpu.memory_space<vmem>>, %arg2: memref<4x64xbf16, #tpu.memory_space<vmem>>, %arg3: memref<1x64xf32, #tpu.memory_space<vmem>>, %arg4: memref<64x128xbf16, #tpu.memory_space<vmem>>, %arg5: memref<1x128xf32, #tpu.memory_space<vmem>>, %arg6: memref<1x128xf32, #tpu.memory_space<vmem>>, %arg7: memref<8x1xf32, #tpu.memory_space<vmem>>, %arg8: memref<8x6xf32, #tpu.memory_space<vmem>>) attributes {dimension_semantics = [#tpu.dimension_semantics<parallel>], iteration_bounds = array<i64: 1>, scalar_prefetch = 0 : i64, scratch_operands = 0 : i64, tpu.core_type = #tpu.core_type<tc>, window_params = [{transform_indices = @transform_0, window_bounds = array<i64: 8, 4>}, {pipeline_mode = #tpu.pipeline_mode<synchronous>, transform_indices = @transform_1, window_bounds = array<i64: 4, 64>}, {pipeline_mode = #tpu.pipeline_mode<synchronous>, transform_indices = @transform_2, window_bounds = array<i64: 1, 64>}, {pipeline_mode = #tpu.pipeline_mode<synchronous>, transform_indices = @transform_3, window_bounds = array<i64: 64, 128>}, {pipeline_mode = #tpu.pipeline_mode<synchronous>, transform_indices = @transform_4, window_bounds = array<i64: 1, 128>}, {pipeline_mode = #tpu.pipeline_mode<synchronous>, transform_indices = @transform_5, window_bounds = array<i64: 1, 128>}, {transform_indices = @transform_6, window_bounds = array<i64: 8, 1>}, {transform_indices = @transform_7, window_bounds = array<i64: 8, 6>}]} {
    %c0 = arith.constant 0 : index
    %c0_0 = arith.constant 0 : index
    %0 = vector.load %arg1[%c0, %c0_0] : memref<8x4xf32, #tpu.memory_space<vmem>>, vector<8x4xf32>
    %1 = arith.truncf %0 : vector<8x4xf32> to vector<8x4xbf16>
    %c0_1 = arith.constant 0 : index
    %c0_2 = arith.constant 0 : index
    %2 = vector.load %arg2[%c0_1, %c0_2] : memref<4x64xbf16, #tpu.memory_space<vmem>>, vector<4x64xbf16>
    %cst = arith.constant dense<0.000000e+00> : vector<8x64xf32>
    %3 = tpu.matmul %1, %2, %cst {dimension_numbers = #tpu.dot_dimension_numbers<[1], [0], [0], [1], [0, 0, 1, 1], [], []>} : vector<8x4xbf16>, vector<4x64xbf16>, vector<8x64xf32> -> vector<8x64xf32>
    %c0_3 = arith.constant 0 : index
    %c0_4 = arith.constant 0 : index
    %4 = vector.load %arg3[%c0_3, %c0_4] : memref<1x64xf32, #tpu.memory_space<vmem>>, vector<1x64xf32>
    %5 = vector.broadcast %4 : vector<1x64xf32> to vector<8x64xf32>
    %6 = arith.addf %3, %5 : vector<8x64xf32>
    %cst_5 = arith.constant 0.000000e+00 : f32
    %7 = vector.broadcast %cst_5 : f32 to vector<8x64xf32>
    %8 = arith.maximumf %6, %7 : vector<8x64xf32>
    %9 = arith.truncf %8 : vector<8x64xf32> to vector<8x64xbf16>
    %c0_6 = arith.constant 0 : index
    %c0_7 = arith.constant 0 : index
    %10 = vector.load %arg4[%c0_6, %c0_7] : memref<64x128xbf16, #tpu.memory_space<vmem>>, vector<64x128xbf16>
    %cst_8 = arith.constant dense<0.000000e+00> : vector<8x128xf32>
    %11 = tpu.matmul %9, %10, %cst_8 {dimension_numbers = #tpu.dot_dimension_numbers<[1], [0], [0], [1], [0, 0, 1, 1], [], []>} : vector<8x64xbf16>, vector<64x128xbf16>, vector<8x128xf32> -> vector<8x128xf32>
    %c0_9 = arith.constant 0 : index
    %c0_10 = arith.constant 0 : index
    %12 = vector.load %arg5[%c0_9, %c0_10] : memref<1x128xf32, #tpu.memory_space<vmem>>, vector<1x128xf32>
    %13 = vector.broadcast %12 : vector<1x128xf32> to vector<8x128xf32>
    %14 = arith.addf %11, %13 : vector<8x128xf32>
    %15 = vector.extract_strided_slice %14 {offsets = [0, 6], sizes = [8, 1], strides = [1, 1]} : vector<8x128xf32> to vector<8x1xf32>
    %c0_11 = arith.constant 0 : index
    %c0_12 = arith.constant 0 : index
    %16 = vector.load %arg7[%c0_11, %c0_12] : memref<8x1xf32, #tpu.memory_space<vmem>>, vector<8x1xf32>
    tpu.vector_store %arg7[%c0_11, %c0_12], %15 {strides = array<i32>} : memref<8x1xf32, #tpu.memory_space<vmem>>, vector<8x1xf32>,
    %c0_13 = arith.constant 0 : index
    %c0_14 = arith.constant 0 : index
    %17 = vector.load %arg6[%c0_13, %c0_14] : memref<1x128xf32, #tpu.memory_space<vmem>>, vector<1x128xf32>
    %18 = vector.broadcast %17 : vector<1x128xf32> to vector<8x128xf32>
    %19 = arith.addf %14, %18 : vector<8x128xf32>
    %cst_15 = arith.constant dense<0xFF800000> : vector<8xf32>
    %20 = vector.multi_reduction <maximumf>, %19, %cst_15 [1] : vector<8x128xf32> to vector<8xf32>
    %21 = vector.shape_cast %20 : vector<8xf32> to vector<8x1xf32>
    %22 = vector.broadcast %21 : vector<8x1xf32> to vector<8x128xf32>
    %23 = arith.subf %19, %22 : vector<8x128xf32>
    %24 = math.exp %23 : vector<8x128xf32>
    %cst_16 = arith.constant dense<0.000000e+00> : vector<8xf32>
    %25 = vector.multi_reduction <add>, %24, %cst_16 [1] : vector<8x128xf32> to vector<8xf32>
    %26 = vector.shape_cast %25 : vector<8xf32> to vector<8x1xf32>
    %27 = tpu.reciprocal %26 {approx = true} : vector<8x1xf32> -> vector<8x1xf32>
    %28 = arith.mulf %26, %27 : vector<8x1xf32>
    %cst_17 = arith.constant 2.000000e+00 : f32
    %29 = vector.broadcast %cst_17 : f32 to vector<8x1xf32>
    %30 = arith.subf %29, %28 : vector<8x1xf32>
    %31 = arith.mulf %27, %30 : vector<8x1xf32>
    %32 = vector.extract_strided_slice %24 {offsets = [0, 0], sizes = [8, 6], strides = [1, 1]} : vector<8x128xf32> to vector<8x6xf32>
    %33 = vector.broadcast %31 : vector<8x1xf32> to vector<8x6xf32>
    %34 = arith.mulf %32, %33 : vector<8x6xf32>
    %c0_18 = arith.constant 0 : index
    %c0_19 = arith.constant 0 : index
    %35 = vector.load %arg8[%c0_18, %c0_19] : memref<8x6xf32, #tpu.memory_space<vmem>>, vector<8x6xf32>
    tpu.vector_store %arg8[%c0_18, %c0_19], %34 {strides = array<i32>} : memref<8x6xf32, #tpu.memory_space<vmem>>, vector<8x6xf32>,
    return
  }
  func.func @transform_0(%arg0: i32) -> (i32, i32) {
    %c0_i32 = arith.constant 0 : i32
    %c0_i32_0 = arith.constant 0 : i32
    return %arg0, %c0_i32 : i32, i32
  }
  func.func @transform_1(%arg0: i32) -> (i32, i32) {
    %c0_i32 = arith.constant 0 : i32
    %c0_i32_0 = arith.constant 0 : i32
    %c0_i32_1 = arith.constant 0 : i32
    return %c0_i32, %c0_i32_0 : i32, i32
  }
  func.func @transform_2(%arg0: i32) -> (i32, i32) {
    %c0_i32 = arith.constant 0 : i32
    %c0_i32_0 = arith.constant 0 : i32
    %c0_i32_1 = arith.constant 0 : i32
    return %c0_i32, %c0_i32_0 : i32, i32
  }
  func.func @transform_3(%arg0: i32) -> (i32, i32) {
    %c0_i32 = arith.constant 0 : i32
    %c0_i32_0 = arith.constant 0 : i32
    %c0_i32_1 = arith.constant 0 : i32
    return %c0_i32, %c0_i32_0 : i32, i32
  }
  func.func @transform_4(%arg0: i32) -> (i32, i32) {
    %c0_i32 = arith.constant 0 : i32
    %c0_i32_0 = arith.constant 0 : i32
    %c0_i32_1 = arith.constant 0 : i32
    return %c0_i32, %c0_i32_0 : i32, i32
  }
  func.func @transform_5(%arg0: i32) -> (i32, i32) {
    %c0_i32 = arith.constant 0 : i32
    %c0_i32_0 = arith.constant 0 : i32
    %c0_i32_1 = arith.constant 0 : i32
    return %c0_i32, %c0_i32_0 : i32, i32
  }
  func.func @transform_6(%arg0: i32) -> (i32, i32) {
    %c0_i32 = arith.constant 0 : i32
    %c0_i32_0 = arith.constant 0 : i32
    return %arg0, %c0_i32 : i32, i32
  }
  func.func @transform_7(%arg0: i32) -> (i32, i32) {
    %c0_i32 = arith.constant 0 : i32
    %c0_i32_0 = arith.constant 0 : i32
    return %arg0, %c0_i32 : i32, i32
  }
}

</mosaic_0001>

<bundles_post_ra>
// kernel: tpu_custom_call.1
= control target key start
LH: loop header
LB: loop body
LE: loop exit
PB: predicated region body
PF: predicated region fallthrough
CT: control target
= control target key end

     0   :  { %13 = vsyncpa [#allocation3], 0  ;;  %s514_s0 = inlined_call_operand.hbm [shape: f32[2,4], index: 0, kind: input, shape index: {}]   ;;  %s515_s1 = inlined_call_operand.vmem [shape: bf16[4,64], index: 1, kind: input, shape index: {}]   ;;  %s516_s2 = inlined_call_operand.vmem [shape: f32[1,64], index: 2, kind: input, shape index: {}]   ;;  %s517_s3 = inlined_call_operand.hbm [shape: bf16[64,128], index: 3, kind: input, shape index: {}]   ;;  %s518_s4 = inlined_call_operand.vmem [shape: f32[1,128], index: 4, kind: input, shape index: {}]   ;;  %s519_s5 = inlined_call_operand.vmem [shape: f32[1,128], index: 5, kind: input, shape index: {}]   ;;  %s520_s6 = inlined_call_operand.vmem [shape: f32[2,1], index: 6, kind: output, shape index: {0}]   ;;  %s521_s7 = inlined_call_operand.hbm [shape: f32[2,6], index: 7, kind: output, shape index: {1}]  }
   0x1   :  { %14 = vsyncpa [#allocation6], 0 }
   0x2   :  { %15 = vsyncpa [#allocation4], 0 }
   0x3   :  { %20 = vsyncadd [#allocation3], 96  ;;  %s407_s24 = smov [#allocation2]   ;;  %s335_s28 = scalar_lea.hbm %s514_s0, 32 }
   0x4   :  { %s21_s25 = sshll.u32 %s407_s24, 4  ;;  %p336_p0 = scmp.ne.s32.totalorder %s514_s0, %s335_s28  ;;  %s22_s25 = int_to_ptr.vmem [resolvable:$true] %s21_s25 }
   0x5   :  { %p339_p1 = scmp.lt.u32.totalorder %s335_s28, %s514_s0 }
   0x7   :  { %p341_p2 = pnand %p339_p1, %p336_p0 }
   0x9   :  { %344 = shalt.err (!%p341_p2)
}
   0xa   :  { %s345_s10 = scalar_lea.vmem %s22_s25, 32  ;;  %s349_s11 = scalar_lea.vmem %s22_s25, 128 }
   0xb   :  { %p346_p3 = scmp.ne.s32.totalorder %s22_s25, %s345_s10  ;;  %p350_p4 = scmp.lt.s32.totalorder %s22_s25, %s22_s25 }
   0xc   :  { %p351_p5 = scmp.lt.s32.totalorder %s349_s11, %s345_s10 }
   0xe   :  { %p352_p6 = por %p351_p5, %p350_p4 }
  0x10   :  { %p353_p7 = pnand %p352_p6, %p346_p3 }
  0x12   :  { %356 = shalt.err (!%p353_p7)
}
  0x13   :  { %s408_s12 = smov 32   ;;  %s409_s13 = smov 2  }
  0x14   :  { %27 = dma.hbm_to_vmem [thread:$0]  %s514_s0, 32, %s22_s25, [#allocation3], %s408_s12, %s408_s12, %s409_s13  }
  0x15   :  { %s410_s16 = smov [#allocation5]   ;;  %s357_s20 = scalar_lea.hbm %s517_s3, 512 }
  0x16   :  { %s37_s17 = sshll.u32 %s410_s16, 4  ;;  %p358_p8 = scmp.ne.s32.totalorder %s517_s3, %s357_s20  ;;  %s38_s17 = int_to_ptr.vmem [resolvable:$true] %s37_s17 }
  0x17   :  { %p361_p9 = scmp.lt.u32.totalorder %s357_s20, %s517_s3 }
  0x19   :  { %p363_p10 = pnand %p361_p9, %p358_p8 }
  0x1b   :  { %366 = shalt.err (!%p363_p10)
}
  0x1c   :  { %s367_s26 = scalar_lea.vmem %s38_s17, 512  ;;  %p372_p12 = scmp.lt.s32.totalorder %s38_s17, %s38_s17 }
  0x1d   :  { %p368_p11 = scmp.ne.s32.totalorder %s38_s17, %s367_s26  ;;  %p373_p13 = scmp.lt.s32.totalorder %s367_s26, %s367_s26 }
  0x1f   :  { %p374_p0 = por %p373_p13, %p372_p12 }
  0x21   :  { %p375_p1 = pnand %p374_p0, %p368_p11 }
  0x23   :  { %378 = shalt.err (!%p375_p1)
}
  0x24   :  { %s411_s0 = smov 64   ;;  %s412_s25 = smov 4  }
  0x25   :  { %43 = dma.hbm_to_vmem [thread:$0]  %s517_s3, 512, %s38_s17, [#allocation6], %s411_s0, %s411_s0, %s412_s25  }
  0x26   :  { %401 = dma.done.wait [#allocation3], 128  }
  0x27   :  { %402 = vsyncadd [#allocation3], 4294967168 }
  0x28   :  { %403 = dma.done.wait [#allocation6], 512  }
  0x29   :  { %404 = vsyncadd [#allocation6], 4294966784  ;;  %v413_v0 = vmov 0.0   ;;  %vm414_vm0 = vmmov 0   ;;  %vm69_vm1 = vcmask 1041408   ;;  %v55_v2 = vld [vmem:[#allocation2] sm:$0xff] }
  0x2a   :  { %299 = vmatprep.subr.bf16.mxu0 %v413_v0  ;;  %301 = vmatprep.mubr.msk.bf16.mxu0 %vm414_vm0, %v413_v0  ;;  %v57_v1 = vld [vmem:[%s515_s1] sm:$0x3]  ;;  %v56_v4 = vpack.c.bf16 %v55_v2, %v55_v2  ;;  %v327_v5 = vld [vmem:[#allocation5] sm:$0xff]   ;;  %vm65_vm2 = vcmask 31744   ;;  %v328_v6 = vld [vmem:[#allocation5 + $0x8] sm:$0xff]   ;;  %vm154_vm3 = vcmask 523264  }
  0x2b   :  { %305 = vmatprep.subr.bf16.mxu1 %v413_v0  ;;  %313 = vmatprep.mubr.msk.bf16.mxu1 %vm414_vm0, %v413_v0  ;;  %v71_v3 = vsel %vm69_vm1, %v57_v1, 0  ;;  %v329_v7 = vld [vmem:[#allocation5 + $0x10] sm:$0xff]   ;;  %v330_v8 = vld [vmem:[#allocation5 + $0x18] sm:$0xff]   ;;  %vm202_vm4 = vcmask 7168   ;;  %vm224_vm5 = vcmask 48128  }
  0x2c   :  { %300 = vmatpush3.bf16.msra.mxu0 %v71_v3  ;;  %306 = vmatpush3.bf16.msra.mxu1 %v327_v5  ;;  %v283_v9 = vld [vmem:[%s516_s2] ss:$0 sm:$0xff]  ;;  %s415_s2 = smov 122  }
  0x2d   :  { %307 = vmatprep.subr.bf16.mxu1 %v413_v0  ;;  %v285_v17 = vld [vmem:[%s518_s4] ss:$0 sm:$0xff] }
  0x2e   :  { %v291_v19 = vld [vmem:[%s519_s5] ss:$0 sm:$0xff] }
  0x2f   :  { %302 = vmatmul.mubr.msk.bf16.vlgmr.msra.gmra.mrb[0].mxu0 %vm65_vm2, %v56_v4 }
  0x30   :  { %308 = vmatpush3.bf16.msra.mxu1 %v328_v6 }
  0x31   :  { %309 = vmatprep.subr.bf16.mxu1 %v413_v0 }
  0x34   :  { %310 = vmatpush3.bf16.msra.mxu1 %v329_v7 }
  0x35   :  { %311 = vmatprep.subr.bf16.mxu1 %v413_v0 }
  0x38   :  { %312 = vmatpush3.bf16.msra.mxu1 %v330_v8 }
 0x102   :  { %v107_v10 = vpop.f32.mrb[0].mxu0 }
 0x103   :  { %v108_v11 = vadd.f32 %v283_v9, %v107_v10  ;;  %v303_v12 = vpop.f32.mrb[1].mxu0 }
 0x104   :  { %v110_v13 = vpop.f32.mrb[2].mxu0 }
 0x105   :  { %v113_v14 = vmax.f32 %v108_v11, 0.0  ;;  %v304_v15 = vpop.f32.mrb[3].mxu0 }
 0x107   :  { %v114_v16 = vpack.c.bf16 %v113_v14, %v113_v14 }
 0x109   :  { %314 = vmatmul.mubr.msk.bf16.vlgmr.msra.gmra.mrb[0].mxu1 %vm154_vm3, %v114_v16 }
 0x1dc   :  { %v192_v18 = vpop.f32.mrb[0].mxu1 }
 0x1dd   :  { %v193_v20 = vadd.f32 %v285_v17, %v192_v18  ;;  %v315_v21 = vpop.f32.mrb[1].mxu1 }
 0x1de   :  { %v195_v22 = vpop.f32.mrb[2].mxu1 }
 0x1df   :  { %199 = vrot.lane.b32.xlu1 %v193_v20, %s415_s2  ;;  %v316_v23 = vpop.f32.mrb[3].mxu1  ;;  %v211_v24 = vadd.f32 %v291_v19, %v193_v20 }
 0x1e1   :  { %212 = vmax.xlane.f32.xlu0 %v211_v24 }
 0x251   :  { %v200_v25 = vpop.permute.xlu1 %199 }
 0x252   :  { %203 = vst.msk [vmem:[#allocation7] sm:$0xff] %vm202_vm4, %v200_v25 }
 0x259   :  { %v243_v26 = vld [vmem:[#allocation7] sm:$0x3] }
 0x25a   :  { %244 = vst [vmem:[%s520_s6] sm:$0x3] %v243_v26 }
 0x26e   :  { %v213_v27 = vpop.xlane.xlu0 %212 }
 0x26f   :  { %v214_v28 = vsub.f32 %v211_v24, %v213_v27 }
 0x271   :  { %v215_v29 = vmul.f32 1.442695, %v214_v28 }
 0x273   :  { %331 = vpow2.f32 %v215_v29 }
 0x27d   :  { %v332_v30 = vpop.eup %331 }
 0x27e   :  { %217 = vadd.xlane.f32.xlu0 %v332_v30 }
 0x30b   :  { %v218_v31 = vpop.xlane.xlu0 %217 }
 0x30c   :  { %333 = vrcp.f32 %v218_v31 }
 0x316   :  { %v334_v32 = vpop.eup %333 }
 0x317   :  { %v220_v33 = vmul.f32 %v334_v32, %v218_v31 }
 0x319   :  { %v221_v34 = vsub.f32 2.0, %v220_v33 }
 0x31b   :  { %v222_v35 = vmul.f32 %v334_v32, %v221_v34 }
 0x31d   :  { %v223_v36 = vmul.f32 %v332_v30, %v222_v35 }
 0x31f   :  { %225 = vst.msk [vmem:[#allocation8] sm:$0xff] %vm224_vm5, %v223_v36 }
 0x320   :  { %263 = vsyncadd [#allocation4], 96  ;;  %s416_s4 = smov [#allocation8]  }
 0x321   :  { %s264_s5 = sshll.u32 %s416_s4, 4  ;;  %s265_s5 = int_to_ptr.vmem [resolvable:$true] %s264_s5 }
 0x322   :  { %s379_s6 = scalar_lea.vmem %s265_s5, 32  ;;  %s383_s16 = scalar_lea.vmem %s265_s5, 128 }
 0x323   :  { %p380_p2 = scmp.ne.s32.totalorder %s265_s5, %s379_s6  ;;  %p384_p3 = scmp.lt.s32.totalorder %s265_s5, %s265_s5 }
 0x324   :  { %p385_p4 = scmp.lt.s32.totalorder %s383_s16, %s379_s6 }
 0x326   :  { %p386_p5 = por %p385_p4, %p384_p3 }
 0x328   :  { %p387_p6 = pnand %p386_p5, %p380_p2 }
 0x32a   :  { %390 = shalt.err (!%p387_p6)
}
 0x32b   :  { %s391_s19 = scalar_lea.hbm %s521_s7, 32 }
 0x32c   :  { %p392_p7 = scmp.ne.s32.totalorder %s521_s7, %s391_s19  ;;  %p395_p8 = scmp.lt.u32.totalorder %s391_s19, %s521_s7 }
 0x32e   :  { %p397_p9 = pnand %p395_p8, %p392_p7 }
 0x330   :  { %400 = shalt.err (!%p397_p9)
}
 0x331   :  { %270 = dma.vmem_to_hbm [thread:$0]  %s265_s5, 32, %s521_s7, [#allocation4], %s408_s12, %s408_s12, %s409_s13  }
 0x332   :  { %405 = dma.done.wait [#allocation4], 128  }
 0x333   :  { %406 = vsyncadd [#allocation4], 4294967168 }
 0x334   :  { %276 = vsyncpa [#allocation3], 1 }
 0x335   :  { %277 = vsyncpa [#allocation6], 1 }
 0x336   :  { %278 = vsyncpa [#allocation4], 1 }

</bundles_post_ra>
